<compile_context>
chip_gen: v5e
topology: v5e:2x2
jax: 0.10.0
libtpu: 0.0.40
codegen_flags: <defaults>
</compile_context>

<pallas_src>
import functools

import jax
import jax.numpy as jnp
from jax.experimental import pallas as pl
from jax.experimental.pallas import tpu as pltpu


def _round_up(x, m):
    return (x + m - 1) // m * m


def actor_mlp_kernel(x_ref, w1_ref, b1_ref, w2_ref, b2_ref, w3_ref, b3_ref,
                     mean_ref):
    # One batch tile per grid step; all weights resident in VMEM (constant index_map).
    x = x_ref[...]

    h1 = jnp.dot(x, w1_ref[...], preferred_element_type=jnp.float32) + b1_ref[...]
    h1 = jnp.maximum(h1, 0.0)                                   # ReLU (VPU)

    h2 = jnp.dot(h1, w2_ref[...], preferred_element_type=jnp.float32) + b2_ref[...]
    h2 = jnp.maximum(h2, 0.0)                                   # ReLU (VPU)

    mean = jnp.dot(h2, w3_ref[...], preferred_element_type=jnp.float32) + b3_ref[...]
    mean_ref[...] = mean.astype(mean_ref.dtype)                 # lane-dense (TB, 128*k) store


@functools.partial(jax.jit, static_argnames=("block_b",))
def actor_forward(state, w1, b1, w2, b2, w3, b3, log_std, *, block_b=256):
    """Returns (mean, std) of the Normal distribution the PyTorch module builds.

    state: (B, input_dims) f32; w*: (in, out) f32; b*: (1, out) f32; log_std: (1, n_actions).
    block_b: batch tile (rows per grid step). 256 keeps the 256-wide MXU fed on
             v6e/v7x; use 128 on v5e (4x128^2 MXU).
    """
    B, in_dims = state.shape
    fc1 = w1.shape[1]
    fc2 = w2.shape[1]
    n_actions = w3.shape[1]

    # ---- padding to hardware-native tiles --------------------------------------
    in_p = _round_up(in_dims, 128)          # K of first matmul -> clean MXU contraction
    n_p = _round_up(n_actions, 128)         # lane-dense output / N of last matmul
    tb = min(block_b, _round_up(B, 8))      # batch tile (multiple of 8 sublanes)
    b_p = _round_up(B, tb)                  # padded batch
    grid_b = b_p // tb

    state_p = jnp.pad(state, ((0, b_p - B), (0, in_p - in_dims)))
    w1_p = jnp.pad(w1, ((0, in_p - in_dims), (0, 0)))
    w3_p = jnp.pad(w3, ((0, 0), (0, n_p - n_actions)))
    b3_p = jnp.pad(b3, ((0, 0), (0, n_p - n_actions)))

    resident = lambda shape: pl.BlockSpec(shape, lambda i: (0,) * len(shape))

    flops = 2 * b_p * (in_p * fc1 + fc1 * fc2 + fc2 * n_p)
    bytes_accessed = 4 * (b_p * in_p + in_p * fc1 + fc1
                          + fc1 * fc2 + fc2
                          + fc2 * n_p + n_p
                          + b_p * n_p)

    mean_p = pl.pallas_call(
        actor_mlp_kernel,
        out_shape=jax.ShapeDtypeStruct((b_p, n_p), jnp.float32),
        grid=(grid_b,),
        in_specs=[
            pl.BlockSpec((tb, in_p), lambda i: (i, 0)),   # state tile, pipelined
            resident((in_p, fc1)), resident((1, fc1)),    # W1, b1 (stay in VMEM)
            resident((fc1, fc2)), resident((1, fc2)),     # W2, b2
            resident((fc2, n_p)), resident((1, n_p)),     # W3, b3 (lane-padded)
        ],
        out_specs=pl.BlockSpec((tb, n_p), lambda i: (i, 0)),
        compiler_params=pltpu.CompilerParams(
            dimension_semantics=("parallel",),            # megacore / 2-TC sharding
        ),
        cost_estimate=pl.CostEstimate(
            flops=flops, transcendentals=0, bytes_accessed=bytes_accessed),
    )(state_p, w1_p, b1, w2, b2, w3_p, b3_p)

    mean = mean_p[:B, :n_actions]

    # std is independent of the matmuls and tiny -> computed in plain JAX.
    std_row = jnp.exp(jnp.clip(log_std, -4.0, 1.0))
    std = jnp.broadcast_to(std_row, mean.shape)
    return mean, std


def init_linear(key, fan_in, fan_out):
    """Deterministic init mirroring nn.Linear: U(-1/sqrt(fan_in), 1/sqrt(fan_in)).
    Weight returned pre-transposed as (fan_in, fan_out)."""
    kw, kb = jax.random.split(key)
    bound = 1.0 / jnp.sqrt(jnp.float32(fan_in))
    w = jax.random.uniform(kw, (fan_in, fan_out), jnp.float32, -bound, bound)
    b = jax.random.uniform(kb, (1, fan_out), jnp.float32, -bound, bound)
    return w, b


def reference_forward(state, w1, b1, w2, b2, w3, b3, log_std):
    h1 = jnp.maximum(state @ w1 + b1, 0.0)
    h2 = jnp.maximum(h1 @ w2 + b2, 0.0)
    mean = h2 @ w3 + b3
    std = jnp.exp(jnp.clip(log_std, -4.0, 1.0))
    return mean, jnp.broadcast_to(std, mean.shape)


if __name__ == "__main__":
    # Small shapes consistent with the module: state is a flat observation vector.
    B = 8             # batch (rollout mini-chunk)
    input_dims = 32   # observation size
    fc1_dims = 256
    fc2_dims = 256
    n_actions = 4

    root = jax.random.PRNGKey(0)
    k_state, k1, k2, k3 = jax.random.split(root, 4)

    state = jax.random.normal(k_state, (B, input_dims), jnp.float32)
    w1, b1 = init_linear(k1, input_dims, fc1_dims)
    w2, b2 = init_linear(k2, fc1_dims, fc2_dims)
    w3, b3 = init_linear(k3, fc2_dims, n_actions)
    log_std = jnp.zeros((1, n_actions), jnp.float32)  # nn.Parameter(torch.zeros(n_actions))

    mean, std = jax.block_until_ready(
        actor_forward(state, w1, b1, w2, b2, w3, b3, log_std)
    )

    ref_mean, ref_std = reference_forward(state, w1, b1, w2, b2, w3, b3, log_std)
    assert mean.shape == (B, n_actions) and std.shape == (B, n_actions)
    assert jnp.allclose(mean, ref_mean, atol=1e-5, rtol=1e-5)
    assert jnp.allclose(std, ref_std, atol=1e-6, rtol=1e-6)

    # Also exercise the multi-tile grid path (B > tile) to validate resident weights.
    B2 = 520
    state2 = jax.random.normal(jax.random.PRNGKey(7), (B2, input_dims), jnp.float32)
    mean2, std2 = jax.block_until_ready(
        actor_forward(state2, w1, b1, w2, b2, w3, b3, log_std)
    )
    ref_mean2, ref_std2 = reference_forward(state2, w1, b1, w2, b2, w3, b3, log_std)
    assert jnp.allclose(mean2, ref_mean2, atol=1e-5, rtol=1e-5)
    assert jnp.allclose(std2, ref_std2, atol=1e-6, rtol=1e-6)

    # TODO(synk): sampling / log_prob of torch.distributions.Normal is not part of
    # forward()'s compute; only (mean, std) parameters are produced here.
    print("KERNEL_OK")
</pallas_src>

<mosaic_0001>
module attributes {stable_mosaic.version = 11 : i64} {
  func.func @actor_mlp_kernel(%arg0: i32, %arg1: memref<8x128xf32, #tpu.memory_space<vmem>>, %arg2: memref<128x256xf32, #tpu.memory_space<vmem>>, %arg3: memref<1x256xf32, #tpu.memory_space<vmem>>, %arg4: memref<256x256xf32, #tpu.memory_space<vmem>>, %arg5: memref<1x256xf32, #tpu.memory_space<vmem>>, %arg6: memref<256x128xf32, #tpu.memory_space<vmem>>, %arg7: memref<1x128xf32, #tpu.memory_space<vmem>>, %arg8: memref<8x128xf32, #tpu.memory_space<vmem>>) attributes {dimension_semantics = [#tpu.dimension_semantics<parallel>], iteration_bounds = array<i64: 1>, scalar_prefetch = 0 : i64, scratch_operands = 0 : i64, tpu.core_type = #tpu.core_type<tc>, window_params = [{transform_indices = @transform_0, window_bounds = array<i64: 8, 128>}, {pipeline_mode = #tpu.pipeline_mode<synchronous>, transform_indices = @transform_1, window_bounds = array<i64: 128, 256>}, {pipeline_mode = #tpu.pipeline_mode<synchronous>, transform_indices = @transform_2, window_bounds = array<i64: 1, 256>}, {pipeline_mode = #tpu.pipeline_mode<synchronous>, transform_indices = @transform_3, window_bounds = array<i64: 256, 256>}, {pipeline_mode = #tpu.pipeline_mode<synchronous>, transform_indices = @transform_4, window_bounds = array<i64: 1, 256>}, {pipeline_mode = #tpu.pipeline_mode<synchronous>, transform_indices = @transform_5, window_bounds = array<i64: 256, 128>}, {pipeline_mode = #tpu.pipeline_mode<synchronous>, transform_indices = @transform_6, window_bounds = array<i64: 1, 128>}, {transform_indices = @transform_7, window_bounds = array<i64: 8, 128>}]} {
    %c0 = arith.constant 0 : index
    %c0_0 = arith.constant 0 : index
    %0 = vector.load %arg1[%c0, %c0_0] : memref<8x128xf32, #tpu.memory_space<vmem>>, vector<8x128xf32>
    %c0_1 = arith.constant 0 : index
    %c0_2 = arith.constant 0 : index
    %1 = vector.load %arg2[%c0_1, %c0_2] : memref<128x256xf32, #tpu.memory_space<vmem>>, vector<128x256xf32>
    %cst = arith.constant dense<0.000000e+00> : vector<8x256xf32>
    %2 = tpu.matmul %0, %1, %cst {dimension_numbers = #tpu.dot_dimension_numbers<[1], [0], [0], [1], [0, 0, 1, 1], [], []>} : vector<8x128xf32>, vector<128x256xf32>, vector<8x256xf32> -> vector<8x256xf32>
    %c0_3 = arith.constant 0 : index
    %c0_4 = arith.constant 0 : index
    %3 = vector.load %arg3[%c0_3, %c0_4] : memref<1x256xf32, #tpu.memory_space<vmem>>, vector<1x256xf32>
    %4 = vector.broadcast %3 : vector<1x256xf32> to vector<8x256xf32>
    %5 = arith.addf %2, %4 : vector<8x256xf32>
    %cst_5 = arith.constant 0.000000e+00 : f32
    %6 = vector.broadcast %cst_5 : f32 to vector<8x256xf32>
    %7 = arith.maximumf %5, %6 : vector<8x256xf32>
    %c0_6 = arith.constant 0 : index
    %c0_7 = arith.constant 0 : index
    %8 = vector.load %arg4[%c0_6, %c0_7] : memref<256x256xf32, #tpu.memory_space<vmem>>, vector<256x256xf32>
    %cst_8 = arith.constant dense<0.000000e+00> : vector<8x256xf32>
    %9 = tpu.matmul %7, %8, %cst_8 {dimension_numbers = #tpu.dot_dimension_numbers<[1], [0], [0], [1], [0, 0, 1, 1], [], []>} : vector<8x256xf32>, vector<256x256xf32>, vector<8x256xf32> -> vector<8x256xf32>
    %c0_9 = arith.constant 0 : index
    %c0_10 = arith.constant 0 : index
    %10 = vector.load %arg5[%c0_9, %c0_10] : memref<1x256xf32, #tpu.memory_space<vmem>>, vector<1x256xf32>
    %11 = vector.broadcast %10 : vector<1x256xf32> to vector<8x256xf32>
    %12 = arith.addf %9, %11 : vector<8x256xf32>
    %cst_11 = arith.constant 0.000000e+00 : f32
    %13 = vector.broadcast %cst_11 : f32 to vector<8x256xf32>
    %14 = arith.maximumf %12, %13 : vector<8x256xf32>
    %c0_12 = arith.constant 0 : index
    %c0_13 = arith.constant 0 : index
    %15 = vector.load %arg6[%c0_12, %c0_13] : memref<256x128xf32, #tpu.memory_space<vmem>>, vector<256x128xf32>
    %cst_14 = arith.constant dense<0.000000e+00> : vector<8x128xf32>
    %16 = tpu.matmul %14, %15, %cst_14 {dimension_numbers = #tpu.dot_dimension_numbers<[1], [0], [0], [1], [0, 0, 1, 1], [], []>} : vector<8x256xf32>, vector<256x128xf32>, vector<8x128xf32> -> vector<8x128xf32>
    %c0_15 = arith.constant 0 : index
    %c0_16 = arith.constant 0 : index
    %17 = vector.load %arg7[%c0_15, %c0_16] : memref<1x128xf32, #tpu.memory_space<vmem>>, vector<1x128xf32>
    %18 = vector.broadcast %17 : vector<1x128xf32> to vector<8x128xf32>
    %19 = arith.addf %16, %18 : vector<8x128xf32>
    %c0_17 = arith.constant 0 : index
    %c0_18 = arith.constant 0 : index
    %20 = vector.load %arg8[%c0_17, %c0_18] : memref<8x128xf32, #tpu.memory_space<vmem>>, vector<8x128xf32>
    tpu.vector_store %arg8[%c0_17, %c0_18], %19 {strides = array<i32>} : memref<8x128xf32, #tpu.memory_space<vmem>>, vector<8x128xf32>,
    return
  }
  func.func @transform_0(%arg0: i32) -> (i32, i32) {
    %c0_i32 = arith.constant 0 : i32
    %c0_i32_0 = arith.constant 0 : i32
    return %arg0, %c0_i32 : i32, i32
  }
  func.func @transform_1(%arg0: i32) -> (i32, i32) {
    %c0_i32 = arith.constant 0 : i32
    %c0_i32_0 = arith.constant 0 : i32
    %c0_i32_1 = arith.constant 0 : i32
    return %c0_i32, %c0_i32_0 : i32, i32
  }
  func.func @transform_2(%arg0: i32) -> (i32, i32) {
    %c0_i32 = arith.constant 0 : i32
    %c0_i32_0 = arith.constant 0 : i32
    %c0_i32_1 = arith.constant 0 : i32
    return %c0_i32, %c0_i32_0 : i32, i32
  }
  func.func @transform_3(%arg0: i32) -> (i32, i32) {
    %c0_i32 = arith.constant 0 : i32
    %c0_i32_0 = arith.constant 0 : i32
    %c0_i32_1 = arith.constant 0 : i32
    return %c0_i32, %c0_i32_0 : i32, i32
  }
  func.func @transform_4(%arg0: i32) -> (i32, i32) {
    %c0_i32 = arith.constant 0 : i32
    %c0_i32_0 = arith.constant 0 : i32
    %c0_i32_1 = arith.constant 0 : i32
    return %c0_i32, %c0_i32_0 : i32, i32
  }
  func.func @transform_5(%arg0: i32) -> (i32, i32) {
    %c0_i32 = arith.constant 0 : i32
    %c0_i32_0 = arith.constant 0 : i32
    %c0_i32_1 = arith.constant 0 : i32
    return %c0_i32, %c0_i32_0 : i32, i32
  }
  func.func @transform_6(%arg0: i32) -> (i32, i32) {
    %c0_i32 = arith.constant 0 : i32
    %c0_i32_0 = arith.constant 0 : i32
    %c0_i32_1 = arith.constant 0 : i32
    return %c0_i32, %c0_i32_0 : i32, i32
  }
  func.func @transform_7(%arg0: i32) -> (i32, i32) {
    %c0_i32 = arith.constant 0 : i32
    %c0_i32_0 = arith.constant 0 : i32
    return %arg0, %c0_i32 : i32, i32
  }
}

</mosaic_0001>

<bundles_post_ra>
// kernel: actor_forward.1
= control target key start
LH: loop header
LB: loop body
LE: loop exit
PB: predicated region body
PF: predicated region fallthrough
CT: control target
= control target key end

     0   :  { %s780_s1 = inlined_call_operand.vmem [shape: f32[128,256], index: 1, kind: input, shape index: {}]   ;;  %s781_s3 = inlined_call_operand.vmem [shape: f32[256,256], index: 3, kind: input, shape index: {}]   ;;  %s782_s0 = inlined_call_operand.vmem [shape: f32[8,128], index: 0, kind: input, shape index: {}]   ;;  %s783_s5 = inlined_call_operand.vmem [shape: f32[256,128], index: 5, kind: input, shape index: {}]   ;;  %s784_s2 = inlined_call_operand.vmem [shape: f32[1,256], index: 2, kind: input, shape index: {}]   ;;  %s785_s4 = inlined_call_operand.vmem [shape: f32[1,256], index: 4, kind: input, shape index: {}]   ;;  %s786_s6 = inlined_call_operand.vmem [shape: f32[1,128], index: 6, kind: input, shape index: {}]   ;;  %s787_s7 = inlined_call_operand.vmem [shape: f32[8,128], index: 7, kind: output, shape index: {}]  }
   0x1   :  { %v57_v0 = vld [vmem:[%s780_s1 + $0xf0] sm:$0xff]  ;;  %v55_v1 = vld [vmem:[%s780_s1 + $0xe0] sm:$0xff]  ;;  %v58_v2 = vld [vmem:[%s780_s1 + $0xf8] sm:$0xff] }
   0x2   :  { %65 = vmatpush.msra.mxu0 %v57_v0  ;;  %85 = vmatpush.msra.mxu1 %v58_v2  ;;  %v56_v3 = vld [vmem:[%s780_s1 + $0xe8] sm:$0xff]  ;;  %v53_v4 = vld [vmem:[%s780_s1 + $0xd0] sm:$0xff]  ;;  %v54_v5 = vld [vmem:[%s780_s1 + $0xd8] sm:$0xff] }
   0x3   :  { %v51_v6 = vld [vmem:[%s780_s1 + $0xc0] sm:$0xff]  ;;  %v52_v7 = vld [vmem:[%s780_s1 + $0xc8] sm:$0xff]  ;;  %v49_v8 = vld [vmem:[%s780_s1 + $0xb0] sm:$0xff] }
   0x4   :  { %66 = vmatpush.msra.mxu0 %v55_v1  ;;  %86 = vmatpush.msra.mxu1 %v56_v3  ;;  %v50_v9 = vld [vmem:[%s780_s1 + $0xb8] sm:$0xff]  ;;  %v47_v10 = vld [vmem:[%s780_s1 + $0xa0] sm:$0xff]  ;;  %v48_v11 = vld [vmem:[%s780_s1 + $0xa8] sm:$0xff] }
   0x5   :  { %v45_v12 = vld [vmem:[%s780_s1 + $0x90] sm:$0xff]  ;;  %v46_v13 = vld [vmem:[%s780_s1 + $0x98] sm:$0xff]  ;;  %v135_v15 = vld [vmem:[%s781_s3 + $0xe0] sm:$0xff] }
   0x6   :  { %67 = vmatpush.msra.mxu0 %v53_v4  ;;  %87 = vmatpush.msra.mxu1 %v54_v5  ;;  %v137_v14 = vld [vmem:[%s781_s3 + $0xf0] sm:$0xff]  ;;  %v43_v16 = vld [vmem:[%s780_s1 + $0x80] sm:$0xff]  ;;  %v44_v17 = vld [vmem:[%s780_s1 + $0x88] sm:$0xff] }
   0x7   :  { %177 = vmatpush.msra.mxu2 %v137_v14  ;;  %v169_v18 = vld [vmem:[%s781_s3 + $0x1f0] sm:$0xff]  ;;  %v167_v20 = vld [vmem:[%s781_s3 + $0x1e0] sm:$0xff]  ;;  %v42_v22 = vld [vmem:[%s780_s1 + $0x78] sm:$0xff] }
   0x8   :  { %68 = vmatpush.msra.mxu0 %v51_v6  ;;  %88 = vmatpush.msra.mxu1 %v52_v7  ;;  %v133_v19 = vld [vmem:[%s781_s3 + $0xd0] sm:$0xff]  ;;  %v131_v23 = vld [vmem:[%s781_s3 + $0xc0] sm:$0xff]  ;;  %v40_v26 = vld [vmem:[%s780_s1 + $0x68] sm:$0xff] }
   0x9   :  { %v41_v21 = vld [vmem:[%s780_s1 + $0x70] sm:$0xff]  ;;  %178 = vmatpush.msra.mxu2 %v135_v15  ;;  %197 = vmatpush.msra.mxu3 %v169_v18  ;;  %v39_v25 = vld [vmem:[%s780_s1 + $0x60] sm:$0xff]  ;;  %v38_v30 = vld [vmem:[%s780_s1 + $0x58] sm:$0xff] }
   0xa   :  { %69 = vmatpush.msra.mxu0 %v49_v8  ;;  %89 = vmatpush.msra.mxu1 %v50_v9  ;;  %v165_v24 = vld [vmem:[%s781_s3 + $0x1d0] sm:$0xff]  ;;  %v163_v28 = vld [vmem:[%s781_s3 + $0x1c0] sm:$0xff]  ;;  %v36_v34 = vld [vmem:[%s780_s1 + $0x48] sm:$0xff] }
   0xb   :  { %179 = vmatpush.msra.mxu2 %v133_v19  ;;  %198 = vmatpush.msra.mxu3 %v167_v20  ;;  %v129_v27 = vld [vmem:[%s781_s3 + $0xb0] sm:$0xff]  ;;  %v127_v31 = vld [vmem:[%s781_s3 + $0xa0] sm:$0xff]  ;;  %v34_v38 = vld [vmem:[%s780_s1 + $0x38] sm:$0xff] }
   0xc   :  { %70 = vmatpush.msra.mxu0 %v47_v10  ;;  %90 = vmatpush.msra.mxu1 %v48_v11  ;;  %v37_v29 = vld [vmem:[%s780_s1 + $0x50] sm:$0xff]  ;;  %v35_v33 = vld [vmem:[%s780_s1 + $0x40] sm:$0xff]  ;;  %v32_v42 = vld [vmem:[%s780_s1 + $0x28] sm:$0xff] }
   0xd   :  { %180 = vmatpush.msra.mxu2 %v131_v23  ;;  %199 = vmatpush.msra.mxu3 %v165_v24  ;;  %v161_v32 = vld [vmem:[%s781_s3 + $0x1b0] sm:$0xff]  ;;  %v159_v36 = vld [vmem:[%s781_s3 + $0x1a0] sm:$0xff]  ;;  %v30_v46 = vld [vmem:[%s780_s1 + $0x18] sm:$0xff] }
   0xe   :  { %71 = vmatpush.msra.mxu0 %v45_v12  ;;  %91 = vmatpush.msra.mxu1 %v46_v13  ;;  %v125_v35 = vld [vmem:[%s781_s3 + $0x90] sm:$0xff]  ;;  %v123_v39 = vld [vmem:[%s781_s3 + $0x80] sm:$0xff]  ;;  %v28_v50 = vld [vmem:[%s780_s1 + $0x8] sm:$0xff] }
   0xf   :  { %181 = vmatpush.msra.mxu2 %v129_v27  ;;  %200 = vmatpush.msra.mxu3 %v163_v28  ;;  %v33_v37 = vld [vmem:[%s780_s1 + $0x30] sm:$0xff]  ;;  %v31_v41 = vld [vmem:[%s780_s1 + $0x20] sm:$0xff]  ;;  %v138_v52 = vld [vmem:[%s781_s3 + $0xf8] sm:$0xff] }
  0x10   :  { %72 = vmatpush.msra.mxu0 %v43_v16  ;;  %92 = vmatpush.msra.mxu1 %v44_v17  ;;  %v157_v40 = vld [vmem:[%s781_s3 + $0x190] sm:$0xff]  ;;  %v155_v44 = vld [vmem:[%s781_s3 + $0x180] sm:$0xff]  ;;  %v170_v53 = vld [vmem:[%s781_s3 + $0x1f8] sm:$0xff] }
  0x11   :  { %182 = vmatpush.msra.mxu2 %v127_v31  ;;  %201 = vmatpush.msra.mxu3 %v161_v32  ;;  %v121_v43 = vld [vmem:[%s781_s3 + $0x70] sm:$0xff]  ;;  %v119_v47 = vld [vmem:[%s781_s3 + $0x60] sm:$0xff]  ;;  %v136_v56 = vld [vmem:[%s781_s3 + $0xe8] sm:$0xff] }
  0x12   :  { %73 = vmatpush.msra.mxu0 %v41_v21  ;;  %93 = vmatpush.msra.mxu1 %v42_v22  ;;  %v29_v45 = vld [vmem:[%s780_s1 + $0x10] sm:$0xff]  ;;  %v27_v49 = vld [vmem:[%s780_s1] sm:$0xff]  ;;  %v168_v57 = vld [vmem:[%s781_s3 + $0x1e8] sm:$0xff] }
  0x13   :  { %183 = vmatpush.msra.mxu2 %v125_v35  ;;  %202 = vmatpush.msra.mxu3 %v159_v36  ;;  %v153_v48 = vld [vmem:[%s781_s3 + $0x170] sm:$0xff]  ;;  %v26_v51 = vld [vmem:[%s782_s0] sm:$0xff]  ;;  %v134_v60 = vld [vmem:[%s781_s3 + $0xd8] sm:$0xff] }
  0x14   :  { %74 = vmatpush.msra.mxu0 %v39_v25  ;;  %94 = vmatpush.msra.mxu1 %v40_v26  ;;  %v117_v54 = vld [vmem:[%s781_s3 + $0x50] sm:$0xff]  ;;  %v151_v55 = vld [vmem:[%s781_s3 + $0x160] sm:$0xff]  ;;  %v166_v61 = vld [vmem:[%s781_s3 + $0x1d8] sm:$0xff] }
  0x15   :  { %184 = vmatpush.msra.mxu2 %v123_v39  ;;  %203 = vmatpush.msra.mxu3 %v157_v40  ;;  %v115_v58 = vld [vmem:[%s781_s3 + $0x40] sm:$0xff]  ;;  %v149_v59 = vld [vmem:[%s781_s3 + $0x150] sm:$0xff]  ;;  %v132_v0 = vld [vmem:[%s781_s3 + $0xc8] sm:$0xff] }
  0x16   :  { %75 = vmatpush.msra.mxu0 %v37_v29  ;;  %95 = vmatpush.msra.mxu1 %v38_v30  ;;  %v113_v62 = vld [vmem:[%s781_s3 + $0x30] sm:$0xff]  ;;  %v147_v63 = vld [vmem:[%s781_s3 + $0x140] sm:$0xff]  ;;  %v164_v1 = vld [vmem:[%s781_s3 + $0x1c8] sm:$0xff] }
  0x17   :  { %185 = vmatpush.msra.mxu2 %v121_v43  ;;  %204 = vmatpush.msra.mxu3 %v155_v44  ;;  %v130_v2 = vld [vmem:[%s781_s3 + $0xb8] sm:$0xff]  ;;  %v128_v4 = vld [vmem:[%s781_s3 + $0xa8] sm:$0xff]  ;;  %v111_v19 = vld [vmem:[%s781_s3 + $0x20] sm:$0xff] }
  0x18   :  { %76 = vmatpush.msra.mxu0 %v35_v33  ;;  %96 = vmatpush.msra.mxu1 %v36_v34  ;;  %v162_v3 = vld [vmem:[%s781_s3 + $0x1b8] sm:$0xff]  ;;  %v160_v5 = vld [vmem:[%s781_s3 + $0x1a8] sm:$0xff]  ;;  %v145_v20 = vld [vmem:[%s781_s3 + $0x130] sm:$0xff] }
  0x19   :  { %186 = vmatpush.msra.mxu2 %v119_v47  ;;  %205 = vmatpush.msra.mxu3 %v153_v48  ;;  %v126_v6 = vld [vmem:[%s781_s3 + $0x98] sm:$0xff]  ;;  %v124_v8 = vld [vmem:[%s781_s3 + $0x88] sm:$0xff]  ;;  %v109_v23 = vld [vmem:[%s781_s3 + $0x10] sm:$0xff] }
  0x1a   :  { %77 = vmatpush.msra.mxu0 %v33_v37  ;;  %97 = vmatpush.msra.mxu1 %v34_v38  ;;  %v158_v7 = vld [vmem:[%s781_s3 + $0x198] sm:$0xff]  ;;  %v156_v9 = vld [vmem:[%s781_s3 + $0x188] sm:$0xff]  ;;  %v143_v24 = vld [vmem:[%s781_s3 + $0x120] sm:$0xff] }
  0x1b   :  { %187 = vmatpush.msra.mxu2 %v117_v54  ;;  %206 = vmatpush.msra.mxu3 %v151_v55  ;;  %v122_v10 = vld [vmem:[%s781_s3 + $0x78] sm:$0xff]  ;;  %v120_v12 = vld [vmem:[%s781_s3 + $0x68] sm:$0xff]  ;;  %v107_v27 = vld [vmem:[%s781_s3] sm:$0xff] }
  0x1c   :  { %78 = vmatpush.msra.mxu0 %v31_v41  ;;  %98 = vmatpush.msra.mxu1 %v32_v42  ;;  %v154_v11 = vld [vmem:[%s781_s3 + $0x178] sm:$0xff]  ;;  %v152_v13 = vld [vmem:[%s781_s3 + $0x168] sm:$0xff]  ;;  %v141_v28 = vld [vmem:[%s781_s3 + $0x110] sm:$0xff] }
  0x1d   :  { %188 = vmatpush.msra.mxu2 %v115_v58  ;;  %207 = vmatpush.msra.mxu3 %v149_v59  ;;  %v118_v14 = vld [vmem:[%s781_s3 + $0x58] sm:$0xff]  ;;  %v116_v16 = vld [vmem:[%s781_s3 + $0x48] sm:$0xff]  ;;  %v139_v31 = vld [vmem:[%s781_s3 + $0x100] sm:$0xff] }
  0x1e   :  { %79 = vmatpush.msra.mxu0 %v29_v45  ;;  %99 = vmatpush.msra.mxu1 %v30_v46  ;;  %v150_v15 = vld [vmem:[%s781_s3 + $0x158] sm:$0xff]  ;;  %v148_v17 = vld [vmem:[%s781_s3 + $0x148] sm:$0xff]  ;;  %v289_v34 = vld [vmem:[%s783_s5 + $0xf0] sm:$0xff] }
  0x1f   :  { %189 = vmatpush.msra.mxu2 %v113_v62  ;;  %208 = vmatpush.msra.mxu3 %v147_v63  ;;  %v114_v18 = vld [vmem:[%s781_s3 + $0x38] sm:$0xff]  ;;  %v112_v21 = vld [vmem:[%s781_s3 + $0x28] sm:$0xff]  ;;  %v273_v36 = vld [vmem:[%s783_s5 + $0x70] sm:$0xff] }
  0x20   :  { %80 = vmatpush.msra.mxu0 %v27_v49  ;;  %100 = vmatpush.msra.mxu1 %v28_v50  ;;  %v146_v22 = vld [vmem:[%s781_s3 + $0x138] sm:$0xff]  ;;  %v144_v26 = vld [vmem:[%s781_s3 + $0x128] sm:$0xff]  ;;  %v287_v39 = vld [vmem:[%s783_s5 + $0xe0] sm:$0xff] }
  0x21   :  { %81 = vmatmul.f32.vlgmr.msra.gmra.mxu0 %v26_v51  ;;  %101 = vmatmul.f32.vlgmr.msra.gmra.mxu1 %v26_v51  ;;  %v110_v25 = vld [vmem:[%s781_s3 + $0x18] sm:$0xff]  ;;  %v108_v29 = vld [vmem:[%s781_s3 + $0x8] sm:$0xff]  ;;  %v271_v40 = vld [vmem:[%s783_s5 + $0x60] sm:$0xff] }
  0x22   :  { %217 = vmatpush.msrb.mxu0 %v138_v52  ;;  %237 = vmatpush.msrb.mxu1 %v170_v53  ;;  %v142_v30 = vld [vmem:[%s781_s3 + $0x118] sm:$0xff]  ;;  %v140_v32 = vld [vmem:[%s781_s3 + $0x108] sm:$0xff]  ;;  %v285_v43 = vld [vmem:[%s783_s5 + $0xd0] sm:$0xff] }
  0x23   :  { %190 = vmatpush.msra.mxu2 %v111_v19  ;;  %209 = vmatpush.msra.mxu3 %v145_v20  ;;  %v290_v33 = vld [vmem:[%s783_s5 + $0xf8] sm:$0xff]  ;;  %v288_v37 = vld [vmem:[%s783_s5 + $0xe8] sm:$0xff]  ;;  %v269_v44 = vld [vmem:[%s783_s5 + $0x50] sm:$0xff] }
  0x24   :  { %218 = vmatpush.msrb.mxu0 %v136_v56  ;;  %238 = vmatpush.msrb.mxu1 %v168_v57  ;;  %v274_v35 = vld [vmem:[%s783_s5 + $0x78] sm:$0xff]  ;;  %v272_v38 = vld [vmem:[%s783_s5 + $0x68] sm:$0xff]  ;;  %v283_v47 = vld [vmem:[%s783_s5 + $0xc0] sm:$0xff] }
  0x25   :  { %191 = vmatpush.msra.mxu2 %v109_v23  ;;  %210 = vmatpush.msra.mxu3 %v143_v24  ;;  %v286_v41 = vld [vmem:[%s783_s5 + $0xd8] sm:$0xff]  ;;  %v284_v45 = vld [vmem:[%s783_s5 + $0xc8] sm:$0xff]  ;;  %v267_v48 = vld [vmem:[%s783_s5 + $0x40] sm:$0xff] }
  0x26   :  { %219 = vmatpush.msrb.mxu0 %v134_v60  ;;  %239 = vmatpush.msrb.mxu1 %v166_v61  ;;  %v270_v42 = vld [vmem:[%s783_s5 + $0x58] sm:$0xff]  ;;  %v268_v46 = vld [vmem:[%s783_s5 + $0x48] sm:$0xff]  ;;  %v281_v51 = vld [vmem:[%s783_s5 + $0xb0] sm:$0xff] }
  0x27   :  { %192 = vmatpush.msra.mxu2 %v107_v27  ;;  %211 = vmatpush.msra.mxu3 %v141_v28  ;;  %v282_v49 = vld [vmem:[%s783_s5 + $0xb8] sm:$0xff]  ;;  %v280_v52 = vld [vmem:[%s783_s5 + $0xa8] sm:$0xff]  ;;  %v59_v53 = vld [vmem:[%s784_s2] sm:$0x3] }
  0x28   :  { %220 = vmatpush.msrb.mxu0 %v132_v0  ;;  %240 = vmatpush.msrb.mxu1 %v164_v1  ;;  %v266_v50 = vld [vmem:[%s783_s5 + $0x38] sm:$0xff]  ;;  %v279_v54 = vld [vmem:[%s783_s5 + $0xa0] sm:$0xff]  ;;  %v61_v55 = vperm.slane %v59_v53, 0  ;;  %v62_v56 = vperm.slane %v59_v53, 1  ;;  %v265_v63 = vld [vmem:[%s783_s5 + $0x30] sm:$0xff] }
  0x29   :  { %212 = vmatpush.msra.mxu3 %v139_v31  ;;  %295 = vmatpush.msrb.mxu2 %v274_v35  ;;  %v278_v0 = vld [vmem:[%s783_s5 + $0x98] sm:$0xff]  ;;  %v264_v1 = vld [vmem:[%s783_s5 + $0x28] sm:$0xff]  ;;  %v340_v23 = vld [vmem:[%s786_s6] ss:$0 sm:$0xff] }
  0x2a   :  { %221 = vmatpush.msrb.mxu0 %v130_v2  ;;  %241 = vmatpush.msrb.mxu1 %v162_v3  ;;  %v277_v2 = vld [vmem:[%s783_s5 + $0x90] sm:$0xff]  ;;  %v263_v3 = vld [vmem:[%s783_s5 + $0x20] sm:$0xff] }
  0x2b   :  { %315 = vmatpush.msrb.mxu3 %v290_v33  ;;  %296 = vmatpush.msrb.mxu2 %v273_v36 }
  0x2c   :  { %222 = vmatpush.msrb.mxu0 %v128_v4  ;;  %242 = vmatpush.msrb.mxu1 %v160_v5  ;;  %v276_v4 = vld [vmem:[%s783_s5 + $0x88] sm:$0xff]  ;;  %v262_v5 = vld [vmem:[%s783_s5 + $0x18] sm:$0xff] }
  0x2d   :  { %316 = vmatpush.msrb.mxu3 %v289_v34  ;;  %297 = vmatpush.msrb.mxu2 %v272_v38 }
  0x2e   :  { %223 = vmatpush.msrb.mxu0 %v126_v6  ;;  %243 = vmatpush.msrb.mxu1 %v158_v7  ;;  %v275_v6 = vld [vmem:[%s783_s5 + $0x80] sm:$0xff]  ;;  %v261_v7 = vld [vmem:[%s783_s5 + $0x10] sm:$0xff] }
  0x2f   :  { %317 = vmatpush.msrb.mxu3 %v288_v37  ;;  %298 = vmatpush.msrb.mxu2 %v271_v40 }
  0x30   :  { %224 = vmatpush.msrb.mxu0 %v124_v8  ;;  %244 = vmatpush.msrb.mxu1 %v156_v9  ;;  %v260_v8 = vld [vmem:[%s783_s5 + $0x8] sm:$0xff]  ;;  %v259_v9 = vld [vmem:[%s783_s5] sm:$0xff] }
  0x31   :  { %318 = vmatpush.msrb.mxu3 %v287_v39  ;;  %299 = vmatpush.msrb.mxu2 %v270_v42 }
  0x32   :  { %225 = vmatpush.msrb.mxu0 %v122_v10  ;;  %245 = vmatpush.msrb.mxu1 %v154_v11  ;;  %v171_v10 = vld [vmem:[%s785_s4] sm:$0x3] }
  0x33   :  { %319 = vmatpush.msrb.mxu3 %v286_v41  ;;  %300 = vmatpush.msrb.mxu2 %v269_v44  ;;  %v174_v11 = vperm.slane %v171_v10, 1 }
  0x34   :  { %226 = vmatpush.msrb.mxu0 %v120_v12  ;;  %246 = vmatpush.msrb.mxu1 %v152_v13 }
  0x35   :  { %320 = vmatpush.msrb.mxu3 %v285_v43  ;;  %301 = vmatpush.msrb.mxu2 %v268_v46 }
  0x36   :  { %227 = vmatpush.msrb.mxu0 %v118_v14  ;;  %247 = vmatpush.msrb.mxu1 %v150_v15 }
  0x37   :  { %321 = vmatpush.msrb.mxu3 %v284_v45  ;;  %302 = vmatpush.msrb.mxu2 %v267_v48 }
  0x38   :  { %228 = vmatpush.msrb.mxu0 %v116_v16  ;;  %248 = vmatpush.msrb.mxu1 %v148_v17  ;;  %v173_v16 = vperm.slane %v171_v10, 0 }
  0x39   :  { %322 = vmatpush.msrb.mxu3 %v283_v47  ;;  %303 = vmatpush.msrb.mxu2 %v266_v50 }
  0x3a   :  { %229 = vmatpush.msrb.mxu0 %v114_v18  ;;  %249 = vmatpush.msrb.mxu1 %v146_v22 }
  0x3b   :  { %323 = vmatpush.msrb.mxu3 %v282_v49  ;;  %304 = vmatpush.msrb.mxu2 %v265_v63 }
  0x3c   :  { %230 = vmatpush.msrb.mxu0 %v112_v21  ;;  %250 = vmatpush.msrb.mxu1 %v144_v26 }
  0x3d   :  { %324 = vmatpush.msrb.mxu3 %v281_v51  ;;  %305 = vmatpush.msrb.mxu2 %v264_v1 }
  0x3e   :  { %231 = vmatpush.msrb.mxu0 %v110_v25  ;;  %251 = vmatpush.msrb.mxu1 %v142_v30 }
  0x3f   :  { %325 = vmatpush.msrb.mxu3 %v280_v52  ;;  %306 = vmatpush.msrb.mxu2 %v263_v3 }
  0x40   :  { %232 = vmatpush.msrb.mxu0 %v108_v29  ;;  %252 = vmatpush.msrb.mxu1 %v140_v32 }
  0x41   :  { %326 = vmatpush.msrb.mxu3 %v279_v54  ;;  %307 = vmatpush.msrb.mxu2 %v262_v5 }
  0x43   :  { %327 = vmatpush.msrb.mxu3 %v278_v0  ;;  %308 = vmatpush.msrb.mxu2 %v261_v7 }
  0x45   :  { %328 = vmatpush.msrb.mxu3 %v277_v2  ;;  %309 = vmatpush.msrb.mxu2 %v260_v8 }
  0x47   :  { %329 = vmatpush.msrb.mxu3 %v276_v4  ;;  %310 = vmatpush.msrb.mxu2 %v259_v9 }
  0x49   :  { %330 = vmatpush.msrb.mxu3 %v275_v6 }
  0x9e   :  { %v82_v57 = vpop.f32.mrf.mxu0  ;;  %v102_v58 = vpop.f32.mrf.mxu1 }
  0x9f   :  { %v83_v59 = vadd.f32 %v82_v57, %v61_v55  ;;  %v103_v60 = vadd.f32 %v102_v58, %v62_v56 }
  0xa1   :  { %v105_v61 = vmax.f32 %v83_v59, 0.0  ;;  %v106_v62 = vmax.f32 %v103_v60, 0.0 }
  0xa3   :  { %193 = vmatmul.f32.vlgmr.msra.gmra.mxu2 %v105_v61  ;;  %233 = vmatmul.f32.vlgmr.msrb.gmra.mxu0 %v105_v61 }
  0xa4   :  { %213 = vmatmul.f32.vlgmr.msra.gmra.mxu3 %v106_v62  ;;  %253 = vmatmul.f32.vlgmr.msrb.gmra.mxu1 %v106_v62 }
 0x120   :  { %v234_v12 = vpop.f32.mrf.mxu0 }
 0x121   :  { %v235_v13 = vadd.f32 %v234_v12, %v174_v11  ;;  %v254_v14 = vpop.f32.mrf.mxu1 }
 0x123   :  { %v255_v15 = vadd.f32 %v254_v14, %v235_v13 }
 0x125   :  { %v258_v17 = vmax.f32 %v255_v15, 0.0 }
 0x126   :  { %v194_v18 = vpop.f32.mrf.mxu2 }
 0x127   :  { %v195_v19 = vadd.f32 %v194_v18, %v173_v16  ;;  %331 = vmatmul.f32.vlgmr.msrb.gmra.mxu3 %v258_v17  ;;  %v214_v20 = vpop.f32.mrf.mxu3 }
 0x129   :  { %v215_v21 = vadd.f32 %v214_v20, %v195_v19 }
 0x12b   :  { %v257_v22 = vmax.f32 %v215_v21, 0.0 }
 0x12d   :  { %311 = vmatmul.f32.vlgmr.msrb.gmra.mxu2 %v257_v22 }
 0x1aa   :  { %v332_v26 = vpop.f32.mrf.mxu3 }
 0x1b0   :  { %v312_v24 = vpop.f32.mrf.mxu2 }
 0x1b1   :  { %v313_v25 = vadd.f32 %v340_v23, %v312_v24 }
 0x1b3   :  { %v333_v27 = vadd.f32 %v332_v26, %v313_v25 }
 0x1b5   :  { %335 = vst [vmem:[%s787_s7] sm:$0xff] %v333_v27 }

</bundles_post_ra>
